<compile_context>
chip_gen: v5e
topology: v5e:2x2
jax: 0.10.0
libtpu: 0.0.40
codegen_flags: <defaults>
</compile_context>

<pallas_src>
import functools

import jax
import jax.numpy as jnp
from jax import lax
from jax.experimental import pallas as pl
from jax.experimental.pallas import tpu as pltpu


def _round_up(v, m):
    return ((v + m - 1) // m) * m


def _vmem_cap_bytes():
    try:
        return int(pltpu.get_tpu_info().vmem_capacity_bytes)
    except Exception:
        return 64 * 1024 * 1024   # conservative fallback (v7x per-TC)


def _lcg_kernel(src_ref, dst_ref, xa_ref, w1_ref, b1_ref, w2_ref, b2_ref,
                out_ref, acc_ref, *, ones_col):
    """Grid step (node_tile ni, edge_tile ei).

    Gather-then-scatter (no N x N intermediate):
      g_t[j, e] = (src[e] == j)                 (N_full, E_tile) bf16, exactly 0/1
      xg        = g_t^T @ xa                    (E_tile, Dp)  == x[src[e]] row pick (exact)
      s_t[i, e] = (dst[e] == row0 + i)          (N_tile, E_tile) bf16
      acc      += s_t @ xg                      (N_tile, Dp)  sums in [0, D), counts in col D
    Finalize on the last edge tile: mean = acc / max(counts, 1), then the 2-layer MLP.
    Padded edges carry src = dst = -1 and therefore match no node.
    """
    f32 = jnp.float32
    bf16 = jnp.bfloat16
    n_full = xa_ref.shape[0]
    n_tile = acc_ref.shape[0]
    e_tile = src_ref.shape[1]
    ei = pl.program_id(1)

    @pl.when(ei == 0)
    def _init():
        acc_ref[...] = jnp.zeros_like(acc_ref)

    # Gather one-hot: nodes on sublanes, edges on lanes (lane-dense compare, no transpose).
    node_ids = lax.broadcasted_iota(jnp.int32, (n_full, e_tile), 0)
    g_t = (src_ref[...] == node_ids).astype(bf16)                       # (N_full, E_tile)
    # Transposed-LHS matmul on the MXU: contract the node axis of both operands.
    xg = lax.dot_general(g_t, xa_ref[...], (((0,), (0,)), ((), ())),
                         preferred_element_type=f32).astype(bf16)       # (E_tile, Dp)

    # Scatter-add into this node tile.
    row0 = pl.program_id(0) * n_tile
    tile_ids = row0 + lax.broadcasted_iota(jnp.int32, (n_tile, e_tile), 0)
    s_t = (dst_ref[...] == tile_ids).astype(bf16)                       # (N_tile, E_tile)
    acc_ref[...] += jnp.dot(s_t, xg, preferred_element_type=f32)        # (N_tile, Dp)

    @pl.when(ei == pl.num_programs(1) - 1)
    def _finalize():
        acc = acc_ref[...]
        counts = acc[:, ones_col:ones_col + 1]                          # exact integers
        inv = pl.reciprocal(jnp.maximum(counts, 1.0), approx=False)     # exact reciprocal
        mean = (acc * inv).astype(bf16)                                 # (N_tile, Dp)
        # Encoder: Linear -> ReLU -> Linear.  Padded weight rows are zero, so the counts
        # column and pad lanes never leak into the output.
        h = jnp.maximum(
            jnp.dot(mean, w1_ref[...], preferred_element_type=f32) + b1_ref[...], 0.0)
        out = jnp.dot(h.astype(bf16), w2_ref[...], preferred_element_type=f32) + b2_ref[...]
        out_ref[...] = out.astype(out_ref.dtype)


def prepare_params(w1, b1, w2, b2):
    """Pad/cast encoder weights once (hoisted off the per-call critical path)."""
    D, L = w1.shape
    LANE = 128
    Dp = _round_up(D + 1, LANE)   # room for x + the ones (counts) column, lane aligned
    Lp = _round_up(L, LANE)
    w1p = jnp.zeros((Dp, Lp), jnp.bfloat16).at[:D, :L].set(w1.astype(jnp.bfloat16))
    b1p = jnp.zeros((1, Lp), jnp.float32).at[0, :L].set(b1.astype(jnp.float32))
    w2p = jnp.zeros((Lp, Lp), jnp.bfloat16).at[:L, :L].set(w2.astype(jnp.bfloat16))
    b2p = jnp.zeros((1, Lp), jnp.float32).at[0, :L].set(b2.astype(jnp.float32))
    return (w1p, b1p, w2p, b2p)


@functools.partial(jax.jit, static_argnames=("local_dim",))
def local_context_gather(x, edge_index, params, *, local_dim):
    """x: (N, node_dim) f32; edge_index: (2, E) int; params from prepare_params."""
    N, D = x.shape
    E = edge_index.shape[1]
    w1p, b1p, w2p, b2p = params
    Dp, Lp = w1p.shape
    L = local_dim
    LANE = 128
    assert Dp == _round_up(D + 1, LANE), "params were prepared for a different node_dim"

    # Tile sizes: MXU-width aligned, reduction (edge) axis last, node axis parallel.
    e_tile = min(512, _round_up(E, LANE))
    Ep = _round_up(E, e_tile)
    n_tile = min(256, _round_up(N, 8))
    Np = _round_up(N, n_tile)

    # Lane-dense edge lists, padded with -1 sentinels (match no node).
    src = jnp.full((1, Ep), -1, jnp.int32).at[0, :E].set(edge_index[1].astype(jnp.int32))
    dst = jnp.full((1, Ep), -1, jnp.int32).at[0, :E].set(edge_index[0].astype(jnp.int32))

    # x augmented with a ones column (fused counts), bf16, zero-padded to (Np, Dp).
    xa = (jnp.zeros((Np, Dp), jnp.bfloat16)
          .at[:N, :D].set(x.astype(jnp.bfloat16))
          .at[:N, D].set(jnp.bfloat16(1.0)))

    # VMEM budget for one grid step (resident inputs double-buffered + temps), capped at
    # the queried device capacity with headroom (v7x: 64 MiB/TC, v5e/v6e: 128 MiB).
    resident = (2 * (Np * Dp + Dp * Lp + Lp * Lp)      # bf16 xa + weights
                + 4 * 2 * Lp                           # f32 biases
                + 4 * 2 * e_tile                       # int32 src/dst tiles
                + 4 * n_tile * Lp)                     # f32 output tile
    scratch = 4 * n_tile * Dp                          # f32 accumulator
    temps = (2 * (Np + n_tile) * e_tile                # bf16 one-hots
             + 4 * Np * e_tile                         # int32 iota for the gather compare
             + 6 * e_tile * Dp                         # xg (f32 + bf16)
             + 4 * n_tile * Dp                         # res
             + 6 * n_tile * Dp + 8 * n_tile * Lp)      # mean / h / out
    est = 2 * resident + scratch + temps
    cap = _vmem_cap_bytes()
    vmem_limit = int(min(0.9 * cap, max(32 * 1024 * 1024, 2 * est)))

    # TODO(synk): for very large graphs (Np * e_tile one-hot exceeding the budget), switch the
    # gather side to scalar-prefetched src + DMA row-gather of x[src] into an (E_tile, Dp)
    # slab, keeping only the single scatter matmul on the MXU.
    out_p = pl.pallas_call(
        functools.partial(_lcg_kernel, ones_col=D),
        out_shape=jax.ShapeDtypeStruct((Np, Lp), jnp.float32),
        grid_spec=pltpu.PrefetchScalarGridSpec(
            num_scalar_prefetch=0,
            grid=(Np // n_tile, Ep // e_tile),
            in_specs=[
                pl.BlockSpec((1, e_tile), lambda ni, ei: (0, ei)),   # src
                pl.BlockSpec((1, e_tile), lambda ni, ei: (0, ei)),   # dst
                pl.BlockSpec((Np, Dp), lambda ni, ei: (0, 0)),       # xa (resident)
                pl.BlockSpec((Dp, Lp), lambda ni, ei: (0, 0)),       # w1
                pl.BlockSpec((1, Lp), lambda ni, ei: (0, 0)),        # b1
                pl.BlockSpec((Lp, Lp), lambda ni, ei: (0, 0)),       # w2
                pl.BlockSpec((1, Lp), lambda ni, ei: (0, 0)),        # b2
            ],
            out_specs=pl.BlockSpec((n_tile, Lp), lambda ni, ei: (ni, 0)),
            scratch_shapes=[pltpu.VMEM((n_tile, Dp), jnp.float32)],
        ),
        compiler_params=pltpu.CompilerParams(
            dimension_semantics=("parallel", "arbitrary"),
            vmem_limit_bytes=vmem_limit),
    )(src, dst, xa, w1p, b1p, w2p, b2p)

    return out_p[:N, :L]


def _reference(x, edge_index, w1, b1, w2, b2):
    N = x.shape[0]
    src = edge_index[1]
    dst = edge_index[0]
    gathered = x[src]                                                   # x[edge_index[1]]
    sums = jnp.zeros((N, x.shape[1]), jnp.float32).at[dst].add(gathered)
    counts = jnp.zeros((N,), jnp.float32).at[dst].add(1.0)
    lc = sums / jnp.maximum(counts, 1.0)[:, None]
    h = jnp.maximum(lc @ w1 + b1, 0.0)
    return h @ w2 + b2


if __name__ == "__main__":
    N, E, node_dim, local_dim = 16, 32, 8, 32

    key = jax.random.PRNGKey(0)
    kx, ke, kw1, kb1, kw2, kb2 = jax.random.split(key, 6)

    x = jax.random.normal(kx, (N, node_dim), jnp.float32)
    edge_index = jax.random.randint(ke, (2, E), 0, N, dtype=jnp.int32)

    # Deterministic synthetic parameters (shapes match nn.Linear(node_dim, local_dim) etc.)
    w1 = jax.random.normal(kw1, (node_dim, local_dim), jnp.float32) * (1.0 / jnp.sqrt(node_dim))
    b1 = jax.random.normal(kb1, (local_dim,), jnp.float32) * 0.05
    w2 = jax.random.normal(kw2, (local_dim, local_dim), jnp.float32) * (1.0 / jnp.sqrt(local_dim))
    b2 = jax.random.normal(kb2, (local_dim,), jnp.float32) * 0.05

    params = prepare_params(w1, b1, w2, b2)   # hoisted: padded/cast once, reused per call

    out = local_context_gather(x, edge_index, params, local_dim=local_dim)
    jax.block_until_ready(out)

    ref = _reference(x, edge_index, w1, b1, w2, b2)
    assert out.shape == (N, local_dim)
    # Tolerance accounts for bf16 MXU operands (x, W1, W2, activations) with f32 accumulation.
    err = float(jnp.max(jnp.abs(out - ref)) / (jnp.max(jnp.abs(ref)) + 1e-6))
    assert err < 2e-2, f"mismatch vs reference: normalized max abs err {err}"

    print("KERNEL_OK")
</pallas_src>

<mosaic_0001>
module attributes {stable_mosaic.version = 11 : i64} {
  func.func @_lcg_kernel(%arg0: i32, %arg1: i32, %arg2: memref<1x128xi32, #tpu.memory_space<vmem>>, %arg3: memref<1x128xi32, #tpu.memory_space<vmem>>, %arg4: memref<16x128xbf16, #tpu.memory_space<vmem>>, %arg5: memref<128x128xbf16, #tpu.memory_space<vmem>>, %arg6: memref<1x128xf32, #tpu.memory_space<vmem>>, %arg7: memref<128x128xbf16, #tpu.memory_space<vmem>>, %arg8: memref<1x128xf32, #tpu.memory_space<vmem>>, %arg9: memref<16x128xf32, #tpu.memory_space<vmem>>, %arg10: memref<16x128xf32, #tpu.memory_space<vmem>>) attributes {dimension_semantics = [#tpu.dimension_semantics<parallel>, #tpu.dimension_semantics<arbitrary>], iteration_bounds = array<i64: 1, 1>, scalar_prefetch = 0 : i64, scratch_operands = 1 : i64, tpu.core_type = #tpu.core_type<tc>, window_params = [{transform_indices = @transform_0, window_bounds = array<i64: 1, 128>}, {transform_indices = @transform_1, window_bounds = array<i64: 1, 128>}, {pipeline_mode = #tpu.pipeline_mode<synchronous>, transform_indices = @transform_2, window_bounds = array<i64: 16, 128>}, {pipeline_mode = #tpu.pipeline_mode<synchronous>, transform_indices = @transform_3, window_bounds = array<i64: 128, 128>}, {pipeline_mode = #tpu.pipeline_mode<synchronous>, transform_indices = @transform_4, window_bounds = array<i64: 1, 128>}, {pipeline_mode = #tpu.pipeline_mode<synchronous>, transform_indices = @transform_5, window_bounds = array<i64: 128, 128>}, {pipeline_mode = #tpu.pipeline_mode<synchronous>, transform_indices = @transform_6, window_bounds = array<i64: 1, 128>}, {transform_indices = @transform_7, window_bounds = array<i64: 16, 128>}]} {
    %c0_i32 = arith.constant 0 : i32
    %0 = arith.cmpi eq, %arg1, %c0_i32 : i32
    %1 = arith.extui %0 : i1 to i32
    %c0_i32_0 = arith.constant 0 : i32
    %2 = arith.cmpi ne, %1, %c0_i32_0 : i32
    scf.if %2 {
      %cst_13 = arith.constant 0.000000e+00 : f32
      %30 = vector.broadcast %cst_13 : f32 to vector<16x128xf32>
      %c0_14 = arith.constant 0 : index
      %c0_15 = arith.constant 0 : index
      %31 = vector.load %arg10[%c0_14, %c0_15] : memref<16x128xf32, #tpu.memory_space<vmem>>, vector<16x128xf32>
      tpu.vector_store %arg10[%c0_14, %c0_15], %30 {strides = array<i32>} : memref<16x128xf32, #tpu.memory_space<vmem>>, vector<16x128xf32>,
    } else {
    }
    %3 = tpu.iota {dimensions = array<i32: 0>} : vector<16x128xi32>
    %c0 = arith.constant 0 : index
    %c0_1 = arith.constant 0 : index
    %4 = vector.load %arg2[%c0, %c0_1] : memref<1x128xi32, #tpu.memory_space<vmem>>, vector<1x128xi32>
    %5 = vector.broadcast %4 : vector<1x128xi32> to vector<16x128xi32>
    %6 = arith.cmpi eq, %5, %3 : vector<16x128xi32>
    %7 = arith.extui %6 : vector<16x128xi1> to vector<16x128xi32>
    %8 = arith.sitofp %7 : vector<16x128xi32> to vector<16x128xf32>
    %9 = arith.truncf %8 : vector<16x128xf32> to vector<16x128xbf16>
    %c0_2 = arith.constant 0 : index
    %c0_3 = arith.constant 0 : index
    %10 = vector.load %arg4[%c0_2, %c0_3] : memref<16x128xbf16, #tpu.memory_space<vmem>>, vector<16x128xbf16>
    %cst = arith.constant dense<0.000000e+00> : vector<128x128xf32>
    %11 = tpu.matmul %9, %10, %cst {dimension_numbers = #tpu.dot_dimension_numbers<[0], [0], [1], [1], [0, 1, 1, 1], [], []>} : vector<16x128xbf16>, vector<16x128xbf16>, vector<128x128xf32> -> vector<128x128xf32>
    %12 = arith.truncf %11 : vector<128x128xf32> to vector<128x128xbf16>
    %c16_i32 = arith.constant 16 : i32
    %13 = arith.muli %arg0, %c16_i32 : i32
    %14 = tpu.iota {dimensions = array<i32: 0>} : vector<16x128xi32>
    %15 = vector.broadcast %13 : i32 to vector<16x128xi32>
    %16 = arith.addi %15, %14 : vector<16x128xi32>
    %c0_4 = arith.constant 0 : index
    %c0_5 = arith.constant 0 : index
    %17 = vector.load %arg3[%c0_4, %c0_5] : memref<1x128xi32, #tpu.memory_space<vmem>>, vector<1x128xi32>
    %18 = vector.broadcast %17 : vector<1x128xi32> to vector<16x128xi32>
    %19 = arith.cmpi eq, %18, %16 : vector<16x128xi32>
    %20 = arith.extui %19 : vector<16x128xi1> to vector<16x128xi32>
    %21 = arith.sitofp %20 : vector<16x128xi32> to vector<16x128xf32>
    %22 = arith.truncf %21 : vector<16x128xf32> to vector<16x128xbf16>
    %c0_6 = arith.constant 0 : index
    %c0_7 = arith.constant 0 : index
    %23 = vector.load %arg10[%c0_6, %c0_7] : memref<16x128xf32, #tpu.memory_space<vmem>>, vector<16x128xf32>
    %cst_8 = arith.constant dense<0.000000e+00> : vector<16x128xf32>
    %24 = tpu.matmul %22, %12, %cst_8 {dimension_numbers = #tpu.dot_dimension_numbers<[1], [0], [0], [1], [0, 0, 1, 1], [], []>} : vector<16x128xbf16>, vector<128x128xbf16>, vector<16x128xf32> -> vector<16x128xf32>
    %25 = arith.addf %23, %24 : vector<16x128xf32>
    %c0_9 = arith.constant 0 : index
    %c0_10 = arith.constant 0 : index
    %26 = vector.load %arg10[%c0_9, %c0_10] : memref<16x128xf32, #tpu.memory_space<vmem>>, vector<16x128xf32>
    tpu.vector_store %arg10[%c0_9, %c0_10], %25 {strides = array<i32>} : memref<16x128xf32, #tpu.memory_space<vmem>>, vector<16x128xf32>,
    %c0_i32_11 = arith.constant 0 : i32
    %27 = arith.cmpi eq, %arg1, %c0_i32_11 : i32
    %28 = arith.extui %27 : i1 to i32
    %c0_i32_12 = arith.constant 0 : i32
    %29 = arith.cmpi ne, %28, %c0_i32_12 : i32
    scf.if %29 {
      %c0_13 = arith.constant 0 : index
      %c0_14 = arith.constant 0 : index
      %30 = vector.load %arg10[%c0_13, %c0_14] : memref<16x128xf32, #tpu.memory_space<vmem>>, vector<16x128xf32>
      %31 = vector.extract_strided_slice %30 {offsets = [0, 8], sizes = [16, 1], strides = [1, 1]} : vector<16x128xf32> to vector<16x1xf32>
      %cst_15 = arith.constant 1.000000e+00 : f32
      %32 = vector.broadcast %cst_15 : f32 to vector<16x1xf32>
      %33 = arith.maximumf %31, %32 : vector<16x1xf32>
      %34 = tpu.reciprocal %33 : vector<16x1xf32> -> vector<16x1xf32>
      %35 = vector.broadcast %34 : vector<16x1xf32> to vector<16x128xf32>
      %36 = arith.mulf %30, %35 : vector<16x128xf32>
      %37 = arith.truncf %36 : vector<16x128xf32> to vector<16x128xbf16>
      %c0_16 = arith.constant 0 : index
      %c0_17 = arith.constant 0 : index
      %38 = vector.load %arg5[%c0_16, %c0_17] : memref<128x128xbf16, #tpu.memory_space<vmem>>, vector<128x128xbf16>
      %cst_18 = arith.constant dense<0.000000e+00> : vector<16x128xf32>
      %39 = tpu.matmul %37, %38, %cst_18 {dimension_numbers = #tpu.dot_dimension_numbers<[1], [0], [0], [1], [0, 0, 1, 1], [], []>} : vector<16x128xbf16>, vector<128x128xbf16>, vector<16x128xf32> -> vector<16x128xf32>
      %c0_19 = arith.constant 0 : index
      %c0_20 = arith.constant 0 : index
      %40 = vector.load %arg6[%c0_19, %c0_20] : memref<1x128xf32, #tpu.memory_space<vmem>>, vector<1x128xf32>
      %41 = vector.broadcast %40 : vector<1x128xf32> to vector<16x128xf32>
      %42 = arith.addf %39, %41 : vector<16x128xf32>
      %cst_21 = arith.constant 0.000000e+00 : f32
      %43 = vector.broadcast %cst_21 : f32 to vector<16x128xf32>
      %44 = arith.maximumf %42, %43 : vector<16x128xf32>
      %45 = arith.truncf %44 : vector<16x128xf32> to vector<16x128xbf16>
      %c0_22 = arith.constant 0 : index
      %c0_23 = arith.constant 0 : index
      %46 = vector.load %arg7[%c0_22, %c0_23] : memref<128x128xbf16, #tpu.memory_space<vmem>>, vector<128x128xbf16>
      %cst_24 = arith.constant dense<0.000000e+00> : vector<16x128xf32>
      %47 = tpu.matmul %45, %46, %cst_24 {dimension_numbers = #tpu.dot_dimension_numbers<[1], [0], [0], [1], [0, 0, 1, 1], [], []>} : vector<16x128xbf16>, vector<128x128xbf16>, vector<16x128xf32> -> vector<16x128xf32>
      %c0_25 = arith.constant 0 : index
      %c0_26 = arith.constant 0 : index
      %48 = vector.load %arg8[%c0_25, %c0_26] : memref<1x128xf32, #tpu.memory_space<vmem>>, vector<1x128xf32>
      %49 = vector.broadcast %48 : vector<1x128xf32> to vector<16x128xf32>
      %50 = arith.addf %47, %49 : vector<16x128xf32>
      %c0_27 = arith.constant 0 : index
      %c0_28 = arith.constant 0 : index
      %51 = vector.load %arg9[%c0_27, %c0_28] : memref<16x128xf32, #tpu.memory_space<vmem>>, vector<16x128xf32>
      tpu.vector_store %arg9[%c0_27, %c0_28], %50 {strides = array<i32>} : memref<16x128xf32, #tpu.memory_space<vmem>>, vector<16x128xf32>,
    } else {
    }
    return
  }
  func.func @transform_0(%arg0: i32, %arg1: i32) -> (i32, i32) {
    %c0_i32 = arith.constant 0 : i32
    %c0_i32_0 = arith.constant 0 : i32
    return %c0_i32, %arg1 : i32, i32
  }
  func.func @transform_1(%arg0: i32, %arg1: i32) -> (i32, i32) {
    %c0_i32 = arith.constant 0 : i32
    %c0_i32_0 = arith.constant 0 : i32
    return %c0_i32, %arg1 : i32, i32
  }
  func.func @transform_2(%arg0: i32, %arg1: i32) -> (i32, i32) {
    %c0_i32 = arith.constant 0 : i32
    %c0_i32_0 = arith.constant 0 : i32
    %c0_i32_1 = arith.constant 0 : i32
    return %c0_i32, %c0_i32_0 : i32, i32
  }
  func.func @transform_3(%arg0: i32, %arg1: i32) -> (i32, i32) {
    %c0_i32 = arith.constant 0 : i32
    %c0_i32_0 = arith.constant 0 : i32
    %c0_i32_1 = arith.constant 0 : i32
    return %c0_i32, %c0_i32_0 : i32, i32
  }
  func.func @transform_4(%arg0: i32, %arg1: i32) -> (i32, i32) {
    %c0_i32 = arith.constant 0 : i32
    %c0_i32_0 = arith.constant 0 : i32
    %c0_i32_1 = arith.constant 0 : i32
    return %c0_i32, %c0_i32_0 : i32, i32
  }
  func.func @transform_5(%arg0: i32, %arg1: i32) -> (i32, i32) {
    %c0_i32 = arith.constant 0 : i32
    %c0_i32_0 = arith.constant 0 : i32
    %c0_i32_1 = arith.constant 0 : i32
    return %c0_i32, %c0_i32_0 : i32, i32
  }
  func.func @transform_6(%arg0: i32, %arg1: i32) -> (i32, i32) {
    %c0_i32 = arith.constant 0 : i32
    %c0_i32_0 = arith.constant 0 : i32
    %c0_i32_1 = arith.constant 0 : i32
    return %c0_i32, %c0_i32_0 : i32, i32
  }
  func.func @transform_7(%arg0: i32, %arg1: i32) -> (i32, i32) {
    %c0_i32 = arith.constant 0 : i32
    %c0_i32_0 = arith.constant 0 : i32
    return %arg0, %c0_i32 : i32, i32
  }
}

</mosaic_0001>

<bundles_post_ra>
// kernel: local_context_gather.1
= control target key start
LH: loop header
LB: loop body
LE: loop exit
PB: predicated region body
PF: predicated region fallthrough
CT: control target
= control target key end

     0   :  { %12 = vsyncpa [#allocation4], 0  ;;  %s721_s0 = inlined_call_operand.vmem [shape: s32[1,128], index: 0, kind: input, shape index: {}]   ;;  %s722_s1 = inlined_call_operand.vmem [shape: s32[1,128], index: 1, kind: input, shape index: {}]   ;;  %s723_s2 = inlined_call_operand.vmem [shape: bf16[16,128], index: 2, kind: input, shape index: {}]   ;;  %s724_s3 = inlined_call_operand.vmem [shape: bf16[128,128], index: 3, kind: input, shape index: {}]   ;;  %s725_s4 = inlined_call_operand.vmem [shape: f32[1,128], index: 4, kind: input, shape index: {}]   ;;  %s726_s5 = inlined_call_operand.hbm [shape: bf16[128,128], index: 5, kind: input, shape index: {}]   ;;  %s727_s6 = inlined_call_operand.vmem [shape: f32[1,128], index: 6, kind: input, shape index: {}]   ;;  %s728_s7 = inlined_call_operand.hbm [shape: f32[16,128], index: 7, kind: output, shape index: {}]  }
   0x1   :  { %13 = vsyncpa [#allocation5], 0  ;;  %s28_s26 = sshll.u32 %s726_s5, 4  ;;  %s610_s27 = smov [#allocation3]   ;;  %s29_s26 = int_to_ptr.hbm [resolvable:$true] %s28_s26 }
   0x2   :  { %s30_s28 = sshll.u32 %s610_s27, 4  ;;  %s611_s29 = smov 64   ;;  %s31_s28 = int_to_ptr.vmem [resolvable:$true] %s30_s28 }
   0x3   :  { %s612_s30 = smov 4  }
   0x4   :  { %36 = dma.hbm_to_vmem [thread:$0]  %s29_s26, 1024, %s31_s28, [#allocation4], %s611_s29, %s611_s29, %s612_s30  }
   0x5   :  { %606 = dma.done.wait [#allocation4], 1024  }
   0x6   :  { %607 = vsyncadd [#allocation4], 4294966272  ;;  %v50_v0 = vlaneseq  ;;  %v550_v3 = vld [vmem:[%s721_s0] ss:$0 sm:$0xff]  ;;  %v613_v5 = vmov 0.0   ;;  %vm86_vm2 = vcmask 130048  }
   0x7   :  { %v519_v4 = vld [vmem:[%s723_s2] sm:$0xff]  ;;  %v614_v42 = vmov 1.0|1.0   ;;  %v615_v43 = vmov 8   ;;  %v527_v44 = vld [vmem:[%s724_s3 + $0x38] sm:$0xff]  ;;  %v526_v45 = vld [vmem:[%s724_s3 + $0x30] sm:$0xff] }
   0x8   :  { %v662_v1 = vshrl.u32 %v50_v0, 7  ;;  %118 = vmatpush.bf16.msra.mxu0 %v519_v4  ;;  %536 = vmatpush.bf16.msra.mxu1 %v519_v4  ;;  %v551_v39 = vld [vmem:[%s722_s1] ss:$0 sm:$0xff]  ;;  %v525_v48 = vld [vmem:[%s724_s3 + $0x28] sm:$0xff]  ;;  %v523_v54 = vld [vmem:[%s724_s3 + $0x18] sm:$0xff]  ;;  %s616_s29 = smov [#allocation6]  }
   0x9   :  { %537 = vmatpush.bf16.msra.mxu2 %v519_v4  ;;  %549 = vset.pattern.permute.xlu1 %v615_v43  ;;  %v524_v49 = vld [vmem:[%s724_s3 + $0x20] sm:$0xff]  ;;  %s422_s30 = sshll.u32 %s616_s29, 4  ;;  %s617_s5 = smov 128   ;;  %s423_s30 = int_to_ptr.vmem [resolvable:$true] %s422_s30 }
   0xa   :  { %v665_v2 = vadd.s32 8, %v662_v1  ;;  %vm55_vm0 = vcmp.eq.s32.totalorder %v550_v3, %v662_v1  ;;  %vm174_vm3 = vcmp.eq.s32.totalorder %v551_v39, %v662_v1  ;;  %s618_s10 = smov 8  }
   0xb   :  { %v437_v6 = vsel %vm55_vm0, 1.0, %v613_v5 }
   0xc   :  { %vm56_vm1 = vcmp.eq.s32.totalorder %v550_v3, %v665_v2  ;;  %vm175_vm4 = vcmp.eq.s32.totalorder %v551_v39, %v665_v2 }
   0xd   :  { %v438_v7 = vsel %vm56_vm1, 1.0, %v613_v5  ;;  %vm453_vm5 = vmpackc.low %vm175_vm4, %vm174_vm3  ;;  %317 = vmatpush.bf16.msrb.mxu2 %v527_v44 }
   0xe   :  { %v61_v8 = vpack.c.bf16 %v438_v7, %v437_v6 }
  0x10   :  { %64 = vxpose.xlu0.c.b16.start.end [1/1] (short) %v61_v8, 128 }
  0x11   :  { %318 = vmatpush.bf16.msrb.mxu2 %v526_v45 }
  0x15   :  { %319 = vmatpush.bf16.msrb.mxu2 %v525_v48 }
  0x19   :  { %320 = vmatpush.bf16.msrb.mxu2 %v524_v49 }
  0x1d   :  { %321 = vmatpush.bf16.msrb.mxu2 %v523_v54 }
  0x77   :  { %548 = vset.pattern.permute.xlu0 %v615_v43 }
  0xbc   :  { %v72_v9 = vpop.trf.xlu0 }
  0xbd   :  { %443 = vmatmul.msk.bf16.vlgmr.msra.gmra.mxu0 %vm86_vm2, %v72_v9  ;;  %v522_v9 = vld [vmem:[%s724_s3 + $0x10] sm:$0xff] }
  0xbe   :  { %322 = vmatpush.bf16.msrb.mxu2 %v522_v9 }
  0xcc   :  { %v73_v10 = vpop.trf.xlu0 }
  0xcd   :  { %444 = vmatmul.msk.bf16.gmra.mxu0 %vm86_vm2, %v73_v10  ;;  %v521_v10 = vld [vmem:[%s724_s3 + $0x8] sm:$0xff] }
  0xce   :  { %323 = vmatpush.bf16.msrb.mxu2 %v521_v10 }
  0xdc   :  { %v74_v11 = vpop.trf.xlu0 }
  0xdd   :  { %445 = vmatmul.msk.bf16.gmra.mxu0 %vm86_vm2, %v74_v11  ;;  %v520_v11 = vld [vmem:[%s724_s3] sm:$0xff] }
  0xde   :  { %324 = vmatpush.bf16.msrb.mxu2 %v520_v11 }
  0xec   :  { %v75_v12 = vpop.trf.xlu0 }
  0xed   :  { %446 = vmatmul.msk.bf16.gmra.mxu0 %vm86_vm2, %v75_v12  ;;  %v535_v12 = vld [vmem:[#allocation3 + $0x38] sm:$0xff] }
  0xee   :  { %402 = vmatpush.bf16.msra.mxu3 %v535_v12 }
  0xfc   :  { %v76_v13 = vpop.trf.xlu0 }
  0xfd   :  { %447 = vmatmul.msk.bf16.vlgmr.msra.gmra.mxu1 %vm86_vm2, %v76_v13  ;;  %v534_v13 = vld [vmem:[#allocation3 + $0x30] sm:$0xff] }
  0xfe   :  { %403 = vmatpush.bf16.msra.mxu3 %v534_v13 }
 0x10c   :  { %v77_v14 = vpop.trf.xlu0 }
 0x10d   :  { %448 = vmatmul.msk.bf16.gmra.mxu1 %vm86_vm2, %v77_v14  ;;  %v533_v14 = vld [vmem:[#allocation3 + $0x28] sm:$0xff] }
 0x10e   :  { %404 = vmatpush.bf16.msra.mxu3 %v533_v14 }
 0x11c   :  { %v78_v15 = vpop.trf.xlu0 }
 0x11d   :  { %449 = vmatmul.msk.bf16.vlgmr.msra.gmra.mxu2 %vm86_vm2, %v78_v15  ;;  %v532_v15 = vld [vmem:[#allocation3 + $0x20] sm:$0xff] }
 0x11e   :  { %405 = vmatpush.bf16.msra.mxu3 %v532_v15 }
 0x12c   :  { %v79_v16 = vpop.trf.xlu0 }
 0x12d   :  { %450 = vmatmul.msk.bf16.gmra.mxu2 %vm86_vm2, %v79_v16 }
 0x13a   :  { %v120_v17 = vpop.f32.mrf.mxu0 }
 0x142   :  { %v122_v18 = vpop.f32.mrf.mxu0 }
 0x143   :  { %v160_v41 = vpack.c.bf16 %v122_v18, %v120_v17 }
 0x14a   :  { %v125_v19 = vpop.f32.mrf.mxu0 }
 0x152   :  { %v127_v20 = vpop.f32.mrf.mxu0 }
 0x153   :  { %v161_v40 = vpack.c.bf16 %v127_v20, %v125_v19 }
 0x15a   :  { %v130_v23 = vpop.f32.mrf.mxu0 }
 0x162   :  { %v132_v27 = vpop.f32.mrf.mxu0 }
 0x163   :  { %v162_v38 = vpack.c.bf16 %v132_v27, %v130_v23  ;;  %v529_v23 = vld [vmem:[#allocation3 + $0x8] sm:$0xff] }
 0x16a   :  { %v135_v31 = vpop.f32.mrf.mxu0 }
 0x172   :  { %v137_v36 = vpop.f32.mrf.mxu0 }
 0x173   :  { %v163_v37 = vpack.c.bf16 %v137_v36, %v135_v31 }
 0x17a   :  { %v140_v21 = vpop.f32.mrf.mxu1 }
 0x182   :  { %v142_v25 = vpop.f32.mrf.mxu1 }
 0x183   :  { %v164_v35 = vpack.c.bf16 %v142_v25, %v140_v21  ;;  %v531_v21 = vld [vmem:[#allocation3 + $0x18] sm:$0xff] }
 0x184   :  { %406 = vmatpush.bf16.msra.mxu3 %v531_v21 }
 0x18a   :  { %v145_v28 = vpop.f32.mrf.mxu1 }
 0x192   :  { %v147_v33 = vpop.f32.mrf.mxu1 }
 0x193   :  { %v165_v34 = vpack.c.bf16 %v147_v33, %v145_v28  ;;  %v553_v33 = vld [vmem:[%s727_s6] ss:$0 sm:$0xff] }
 0x1a0   :  { %v150_v22 = vpop.f32.mrf.mxu2 }
 0x1a8   :  { %v152_v24 = vpop.f32.mrf.mxu2 }
 0x1a9   :  { %v166_v32 = vpack.c.bf16 %v152_v24, %v150_v22  ;;  %v530_v22 = vld [vmem:[#allocation3 + $0x10] sm:$0xff]  ;;  %v528_v24 = vld [vmem:[#allocation3] sm:$0xff] }
 0x1aa   :  { %407 = vmatpush.bf16.msra.mxu3 %v530_v22 }
 0x1ae   :  { %408 = vmatpush.bf16.msra.mxu3 %v529_v23 }
 0x1b0   :  { %v155_v26 = vpop.f32.mrf.mxu2 }
 0x1b2   :  { %409 = vmatpush.bf16.msra.mxu3 %v528_v24 }
 0x1b8   :  { %v157_v29 = vpop.f32.mrf.mxu2 }
 0x1b9   :  { %v167_v30 = vpack.c.bf16 %v157_v29, %v155_v26  ;;  %v552_v26 = vld [vmem:[%s725_s4] ss:$0 sm:$0xff]  ;;  %s424_s4 = sshll.u32 %s728_s7, 4  ;;  %s425_s4 = int_to_ptr.hbm [resolvable:$true] %s424_s4 }
 0x1bb   :  { %183 = vmatpush.bf16.msrb.mxu1 %v167_v30 }
 0x1bf   :  { %184 = vmatpush.bf16.msrb.mxu1 %v166_v32 }
 0x1c3   :  { %185 = vmatpush.bf16.msrb.mxu1 %v165_v34 }
 0x1c7   :  { %186 = vmatpush.bf16.msrb.mxu1 %v164_v35 }
 0x1cb   :  { %187 = vmatpush.bf16.msrb.mxu1 %v163_v37 }
 0x1cf   :  { %188 = vmatpush.bf16.msrb.mxu1 %v162_v38 }
 0x1d3   :  { %189 = vmatpush.bf16.msrb.mxu1 %v161_v40 }
 0x1d7   :  { %190 = vmatpush.bf16.msrb.mxu1 %v160_v41 }
 0x1da   :  { %454 = vmatmul.msk.bf16.vlgmr.msrb.gmra.mxu1 %vm453_vm5, %v614_v42 }
 0x257   :  { %v192_v46 = vpop.f32.mrf.mxu1 }
 0x258   :  { %v206_v47 = vmax.f32 %v192_v46, 1.0 }
 0x25a   :  { %554 = vrcp.f32 %v206_v47  ;;  %v219_v56 = vand.u32 2147483648, %v206_v47  ;;  %v217_v58 = vand.u32 2147483647, %v206_v47  ;;  %vm213_vm7 = vweird.f32 %v206_v47 }
 0x25c   :  { %v220_v61 = vor.u32 1.1754944e-38, %v219_v56  ;;  %vm218_vm9 = vcmp.eq.f32.partialorder %v217_v58, 8.507059e+37 }
 0x25f   :  { %v194_v50 = vpop.f32.mrf.mxu1 }
 0x260   :  { %v555_v51 = vpop.eup %554  ;;  %v207_v52 = vmax.f32 %v194_v50, 1.0 }
 0x261   :  { %v209_v53 = vmul.f32 %v555_v51, %v206_v47  ;;  %vm214_vm6 = vweird.f32 %v555_v51 }
 0x262   :  { %556 = vrcp.f32 %v207_v52  ;;  %vm215_vm8 = vmor %vm213_vm7, %vm214_vm6  ;;  %v233_v2 = vand.u32 2147483648, %v207_v52  ;;  %v231_v4 = vand.u32 2147483647, %v207_v52  ;;  %vm227_vm11 = vweird.f32 %v207_v52 }
 0x263   :  { %v210_v55 = vsub.f32 1.0, %v209_v53 }
 0x264   :  { %v234_v6 = vor.u32 1.1754944e-38, %v233_v2  ;;  %vm232_vm13 = vcmp.eq.f32.partialorder %v231_v4, 8.507059e+37 }
 0x265   :  { %v211_v57 = vmul.f32 %v555_v51, %v210_v55 }
 0x267   :  { %v212_v59 = vadd.f32 %v555_v51, %v211_v57 }
 0x268   :  { %v557_v60 = vpop.eup %556 }
 0x269   :  { %v216_v62 = vsel %vm215_vm8, %v555_v51, %v212_v59  ;;  %v223_v63 = vmul.f32 %v557_v60, %v207_v52  ;;  %vm228_vm10 = vweird.f32 %v557_v60 }
 0x26a   :  { %v221_v0 = vsel %vm218_vm9, %v220_v61, %v216_v62  ;;  %vm229_vm12 = vmor %vm227_vm11, %vm228_vm10 }
 0x26b   :  { %238 = vperm.xlu0 %548, %v221_v0   ;;  %v224_v1 = vsub.f32 1.0, %v223_v63 }
 0x26d   :  { %v225_v3 = vmul.f32 %v557_v60, %v224_v1 }
 0x26f   :  { %v226_v5 = vadd.f32 %v557_v60, %v225_v3 }
 0x271   :  { %v230_v7 = vsel %vm229_vm12, %v557_v60, %v226_v5 }
 0x272   :  { %v235_v8 = vsel %vm232_vm13, %v234_v6, %v230_v7 }
 0x273   :  { %243 = vperm.xlu1 %549, %v235_v8  }
 0x2dd   :  { %v239_v16 = vpop.permute.xlu0 %238 }
 0x2de   :  { %v246_v18 = vmul.f32 %v239_v16, %v192_v46 }
 0x2e5   :  { %v244_v17 = vpop.permute.xlu1 %243 }
 0x2e6   :  { %v247_v19 = vmul.f32 %v244_v17, %v194_v50 }
 0x2e8   :  { %v248_v20 = vpack.c.bf16 %v247_v19, %v246_v18 }
 0x2ea   :  { %325 = vmatmul.bf16.vlgmr.msrb.gmra.mxu2 %v248_v20 }
 0x36d   :  { %v326_v25 = vpop.f32.mrf.mxu2 }
 0x36e   :  { %v327_v27 = vadd.f32 %v552_v26, %v326_v25 }
 0x370   :  { %v331_v30 = vmax.f32 %v327_v27, 0.0 }
 0x375   :  { %v328_v28 = vpop.f32.mrf.mxu2 }
 0x376   :  { %v329_v29 = vadd.f32 %v552_v26, %v328_v28 }
 0x378   :  { %v332_v31 = vmax.f32 %v329_v29, 0.0 }
 0x37a   :  { %v333_v32 = vpack.c.bf16 %v332_v31, %v331_v30 }
 0x37c   :  { %410 = vmatmul.bf16.vlgmr.msra.gmra.mxu3 %v333_v32 }
 0x3ff   :  { %v411_v34 = vpop.f32.mrf.mxu3 }
 0x400   :  { %v412_v35 = vadd.f32 %v553_v33, %v411_v34 }
 0x402   :  { %416 = vst [vmem:[#allocation6] sm:$0xff] %v412_v35 }
 0x407   :  { %v413_v36 = vpop.f32.mrf.mxu3 }
 0x408   :  { %v414_v37 = vadd.f32 %v553_v33, %v413_v36 }
 0x40a   :  { %417 = vst [vmem:[#allocation6 + $0x8] sm:$0xff] %v414_v37 }
 0x40b   :  { %430 = dma.vmem_to_hbm [thread:$0]  %s423_s30, 256, %s425_s4, [#allocation5], %s617_s5, %s617_s5, %s618_s10  }
 0x40c   :  { %608 = dma.done.wait [#allocation5], 256  }
 0x40d   :  { %609 = vsyncadd [#allocation5], 4294967040 }
 0x40e   :  { %435 = vsyncpa [#allocation4], 1 }
 0x40f   :  { %436 = vsyncpa [#allocation5], 1 }

</bundles_post_ra>
